<compile_context>
chip_gen: v5e
topology: v5e:2x2
jax: 0.10.0
libtpu: 0.0.40
codegen_flags: <defaults>
</compile_context>

<pallas_src>
import functools

import numpy as np
import jax
import jax.numpy as jnp
from jax.experimental import pallas as pl
from jax.experimental.pallas import tpu as pltpu


def _idsf_kernel(inv_scale, q_ref, v_ref, vp2_ref, mb_ref, wp1_ref, bp_ref, o_ref):
    # Per-step block shapes:
    #   q_ref  : (Bblk, S, H)  (bf16 or f32 wire format)
    #   v_ref / vp2_ref : (Bblk, 1, H)  f32
    #   mb_ref : (Bblk, S, 1)  f32 (0 or -inf)
    #   wp1_ref: (H, H)   bp_ref: (1, H)
    Bblk, S, H = q_ref.shape

    # bf16 on the wire halves HBM traffic; compute in f32 (mem-bound kernel,
    # MXU/VPU precision is not the bottleneck and f32 keeps layouts simple).
    q = q_ref[...].astype(jnp.float32)                        # (Bblk, S, H)
    v = v_ref[...]                                            # (Bblk, 1, H)
    vp2 = vp2_ref[...]                                        # (Bblk, 1, H)
    mbias = mb_ref[...]                                       # (Bblk, S, 1)

    # att_scores = bmm(queries, values^T) / sqrt(H)  (+ mask bias) -> (Bblk,S,1)
    scores = jnp.sum(q * v, axis=-1, keepdims=True) * inv_scale + mbias

    # softmax over the sequence dimension (torch dim=1), numerically stable.
    s_max = jnp.max(scores, axis=1, keepdims=True)            # (Bblk,1,1)
    e = jnp.exp(scores - s_max)                               # (Bblk,S,1)
    denom = jnp.sum(e, axis=1, keepdims=True)                 # (Bblk,1,1)
    att_w = e * pl.reciprocal(denom, approx=False)            # (Bblk,S,1)

    # att_output @ Wp2^T == att_w (x) (v @ Wp2^T)   (rank-1, VPU only)
    att_contrib = att_w * vp2                                 # (Bblk,S,H)

    # queries half of proj: one flattened (Bblk*S, H) @ (H, H) MXU matmul.
    qf = q.reshape(Bblk * S, H)                               # leading-dim merge only
    wp1 = wp1_ref[...].astype(jnp.float32)
    qp = jnp.dot(qf, wp1, preferred_element_type=jnp.float32).reshape(Bblk, S, H)

    out = jnp.maximum(qp + att_contrib + bp_ref[...], 0.0)
    # TODO(synk): for H < 128 this store is lane-masked; a lane-dense (B, S*H)
    # output layout needs an in-kernel sublane->lane reshape that Mosaic does
    # not reliably lower yet, so it is deferred.
    o_ref[...] = out.astype(o_ref.dtype)


def _round_up(x, m):
    return (x + m - 1) // m * m


def _padded_slab_bytes(s, h, itemsize):
    """VMEM bytes of one (s, h) slab after (sublane, 128)-lane tile padding."""
    sub = max(32 // itemsize, 8)          # 8 sublanes for f32, 16 for bf16
    return _round_up(max(s, 1), sub) * _round_up(max(h, 1), 128) * itemsize


def _vmem_capacity_bytes(default=64 << 20):
    """Generation-aware VMEM capacity; conservative (v7x-sized) fallback."""
    try:
        cap = getattr(pltpu.get_tpu_info(), "vmem_capacity_bytes", None)
        if cap:
            return int(cap)
    except Exception:
        pass
    return default


def _pick_block_batches(B, S, H, q_item, out_item, budget):
    """Largest batch block whose *padded* double-buffered tiles fit `budget`,
    preferring >=4 grid steps (>=2 per TensorCore on v7x), then >=2, then 1."""
    weights = 2 * _padded_slab_bytes(H, H, q_item) + 2 * _padded_slab_bytes(1, H, 4)
    per_b = (2 * _padded_slab_bytes(S, H, q_item)       # queries (double-buffered)
             + 2 * _padded_slab_bytes(S, H, out_item)   # output  (double-buffered)
             + 4 * _padded_slab_bytes(1, H, 4)          # v, vp2
             + 2 * _padded_slab_bytes(S, 1, 4)          # mask bias
             + 4 * _padded_slab_bytes(S, H, 4))         # f32 working set / spill headroom

    divisors = [d for d in range(1, B + 1) if B % d == 0]
    feasible = [d for d in divisors if d * per_b + weights <= budget] or [1]
    for min_steps in (4, 2, 1):
        tier = [d for d in feasible if B // d >= min_steps]
        if tier:
            return max(tier)
    return max(feasible)


def idsf_attention(queries, values, query_mask, w_v, w_p, b_p,
                   *, use_bf16=True, out_dtype=None, block_batches=None):
    """Pallas implementation of IDSFAttention.forward.

    queries   : (B, S, H) float32
    values    : (B, 1, D) float32
    query_mask: (B, S)    (0 = mask out, nonzero = keep; matches torch `== 0`)
    w_v       : (H, D)    value_mlp_in.weight
    w_p       : (H, 2H)   proj[0].weight
    b_p       : (H,)      proj[0].bias
    returns   : (B, S, H) in `out_dtype` (bf16 by default — production wire format)
    """
    B, S, H = queries.shape

    # Hoisted tiny matmuls (one fused XLA batched matmul each).
    v = jnp.einsum("btd,hd->bth", values, w_v).astype(jnp.float32)       # (B,1,H)
    vp2 = jnp.einsum("bth,gh->btg", v, w_p[:, H:]).astype(jnp.float32)   # (B,1,H)

    wp1_t = w_p[:, :H].T                                                 # (H,H)
    bp = b_p.reshape(1, H).astype(jnp.float32)

    # Additive mask bias: -inf exactly where query_mask == 0 (torch semantics).
    mask_bias = jnp.where(query_mask == 0, -jnp.inf, 0.0).astype(jnp.float32)
    mask_bias = mask_bias.reshape(B, S, 1)

    inv_scale = float(1.0 / np.sqrt(H))

    wire_dtype = jnp.bfloat16 if use_bf16 else queries.dtype
    q_in = queries.astype(wire_dtype)
    wp1_in = wp1_t.astype(wire_dtype)
    if out_dtype is None:
        out_dtype = wire_dtype
    q_item = jnp.dtype(wire_dtype).itemsize
    out_item = jnp.dtype(out_dtype).itemsize

    # Generation-aware VMEM budgeting: picker uses ~0.75x capacity; the
    # compiler limit gets capacity minus 16 MiB headroom (never full physical).
    cap = _vmem_capacity_bytes()
    vmem_limit = int(max(cap - (16 << 20), 32 << 20))
    budget = int(min(3 * cap // 4, vmem_limit))

    Bblk = block_batches or _pick_block_batches(B, S, H, q_item, out_item, budget)
    assert B % Bblk == 0, "block_batches must divide the batch size"
    grid = (B // Bblk,)

    kernel = functools.partial(_idsf_kernel, inv_scale)

    # Note: Wp1/bias have constant index_maps so they are fetched once; at
    # large H, pipeline_mode=pl.Buffered(1) on those specs would also drop the
    # second weight buffer (negligible at H=32).
    return pl.pallas_call(
        kernel,
        out_shape=jax.ShapeDtypeStruct((B, S, H), out_dtype),
        grid=grid,
        in_specs=[
            pl.BlockSpec((Bblk, S, H), lambda b: (b, 0, 0)),   # queries (wire dtype)
            pl.BlockSpec((Bblk, 1, H), lambda b: (b, 0, 0)),   # v = value MLP out
            pl.BlockSpec((Bblk, 1, H), lambda b: (b, 0, 0)),   # vp2 = v @ Wp2^T
            pl.BlockSpec((Bblk, S, 1), lambda b: (b, 0, 0)),   # mask bias
            pl.BlockSpec((H, H), lambda b: (0, 0)),            # Wp1^T (resident)
            pl.BlockSpec((1, H), lambda b: (0, 0)),            # proj bias
        ],
        out_specs=pl.BlockSpec((Bblk, S, H), lambda b: (b, 0, 0)),
        compiler_params=pltpu.CompilerParams(
            dimension_semantics=("parallel",),
            vmem_limit_bytes=vmem_limit),
    )(q_in, v, vp2, mask_bias, wp1_in, bp)


def idsf_attention_reference(queries, values, query_mask, w_v, w_p, b_p):
    """Pure-JAX reference mirroring the PyTorch forward exactly."""
    H = w_v.shape[0]
    v = values @ w_v.T                                                # (B,1,H)
    scores = jnp.einsum("bsh,bth->bst", queries, v) / np.sqrt(H)      # (B,S,1)
    scores = jnp.where(query_mask[..., None] == 0, -jnp.inf, scores)
    w = jax.nn.softmax(scores, axis=1)
    att = jnp.einsum("bst,bth->bsh", w, v)                            # (B,S,H)
    mix = jnp.concatenate([queries, att], axis=-1)                    # (B,S,2H)
    return jax.nn.relu(mix @ w_p.T + b_p)


if __name__ == "__main__":
    # batch=8 so the batch-blocking path (Bblk=2, grid=4) is actually exercised.
    B, S, H, D = 8, 8, 32, 16   # batch, seq_len, hidden_dim, num_intent (in_dim)

    key = jax.random.PRNGKey(0)
    kq, kv, k1, k2, k3 = jax.random.split(key, 5)

    queries = jax.random.normal(kq, (B, S, H), dtype=jnp.float32)
    values = jax.random.normal(kv, (B, 1, D), dtype=jnp.float32)
    # Per-sample valid lengths (all >= 1; a fully-masked row would NaN, same as torch).
    lengths = jnp.array([S, 5, S, 3, 1, S, 6, 2])
    query_mask = (jnp.arange(S)[None, :] < lengths[:, None]).astype(jnp.float32)

    # Deterministic synthetic parameters (module __init__ shapes).
    w_v = 0.1 * jax.random.normal(k1, (H, D), dtype=jnp.float32)       # value_mlp_in.weight
    w_p = 0.1 * jax.random.normal(k2, (H, 2 * H), dtype=jnp.float32)   # proj[0].weight
    b_p = 0.1 * jax.random.normal(k3, (H,), dtype=jnp.float32)         # proj[0].bias

    ref = idsf_attention_reference(queries, values, query_mask, w_v, w_p, b_p)

    # Exact-math path: f32 wire format, must match the PyTorch forward to 1e-5.
    out_f32 = jax.block_until_ready(
        idsf_attention(queries, values, query_mask, w_v, w_p, b_p, use_bf16=False))
    np.testing.assert_allclose(np.asarray(out_f32), np.asarray(ref), rtol=1e-5, atol=1e-5)

    # Production default: bf16 wire format for queries / Wp1 / output.
    out_bf16 = jax.block_until_ready(
        idsf_attention(queries, values, query_mask, w_v, w_p, b_p))
    np.testing.assert_allclose(np.asarray(out_bf16).astype(np.float32),
                               np.asarray(ref), rtol=2e-2, atol=2e-2)

    print("KERNEL_OK")
</pallas_src>

<mosaic_0001>
module attributes {stable_mosaic.version = 11 : i64} {
  func.func @_idsf_kernel(%arg0: i32, %arg1: memref<2x8x32xf32, #tpu.memory_space<vmem>>, %arg2: memref<2x1x32xf32, #tpu.memory_space<vmem>>, %arg3: memref<2x1x32xf32, #tpu.memory_space<vmem>>, %arg4: memref<2x8x1xf32, #tpu.memory_space<vmem>>, %arg5: memref<32x32xf32, #tpu.memory_space<vmem>>, %arg6: memref<1x32xf32, #tpu.memory_space<vmem>>, %arg7: memref<2x8x32xf32, #tpu.memory_space<vmem>>) attributes {dimension_semantics = [#tpu.dimension_semantics<parallel>], iteration_bounds = array<i64: 4>, scalar_prefetch = 0 : i64, scratch_operands = 0 : i64, tpu.core_type = #tpu.core_type<tc>, window_params = [{transform_indices = @transform_0, window_bounds = array<i64: 2, 8, 32>}, {transform_indices = @transform_1, window_bounds = array<i64: 2, 1, 32>}, {transform_indices = @transform_2, window_bounds = array<i64: 2, 1, 32>}, {transform_indices = @transform_3, window_bounds = array<i64: 2, 8, 1>}, {pipeline_mode = #tpu.pipeline_mode<synchronous>, transform_indices = @transform_4, window_bounds = array<i64: 32, 32>}, {pipeline_mode = #tpu.pipeline_mode<synchronous>, transform_indices = @transform_5, window_bounds = array<i64: 1, 32>}, {transform_indices = @transform_6, window_bounds = array<i64: 2, 8, 32>}]} {
    %c0 = arith.constant 0 : index
    %c0_0 = arith.constant 0 : index
    %c0_1 = arith.constant 0 : index
    %0 = vector.load %arg1[%c0, %c0_0, %c0_1] : memref<2x8x32xf32, #tpu.memory_space<vmem>>, vector<2x8x32xf32>
    %c0_2 = arith.constant 0 : index
    %c0_3 = arith.constant 0 : index
    %c0_4 = arith.constant 0 : index
    %1 = vector.load %arg2[%c0_2, %c0_3, %c0_4] : memref<2x1x32xf32, #tpu.memory_space<vmem>>, vector<2x1x32xf32>
    %c0_5 = arith.constant 0 : index
    %c0_6 = arith.constant 0 : index
    %c0_7 = arith.constant 0 : index
    %2 = vector.load %arg3[%c0_5, %c0_6, %c0_7] : memref<2x1x32xf32, #tpu.memory_space<vmem>>, vector<2x1x32xf32>
    %c0_8 = arith.constant 0 : index
    %c0_9 = arith.constant 0 : index
    %c0_10 = arith.constant 0 : index
    %3 = vector.load %arg4[%c0_8, %c0_9, %c0_10] : memref<2x8x1xf32, #tpu.memory_space<vmem>>, vector<2x8x1xf32>
    %4 = vector.broadcast %1 : vector<2x1x32xf32> to vector<2x8x32xf32>
    %5 = arith.mulf %0, %4 : vector<2x8x32xf32>
    %cst = arith.constant dense<0.000000e+00> : vector<2x8xf32>
    %6 = vector.multi_reduction <add>, %5, %cst [2] : vector<2x8x32xf32> to vector<2x8xf32>
    %7 = vector.shape_cast %6 : vector<2x8xf32> to vector<2x8x1xf32>
    %cst_11 = arith.constant 0.176776692 : f32
    %8 = vector.broadcast %cst_11 : f32 to vector<2x8x1xf32>
    %9 = arith.mulf %7, %8 : vector<2x8x1xf32>
    %10 = arith.addf %9, %3 : vector<2x8x1xf32>
    %cst_12 = arith.constant dense<0xFF800000> : vector<2x1xf32>
    %11 = vector.multi_reduction <maximumf>, %10, %cst_12 [1] : vector<2x8x1xf32> to vector<2x1xf32>
    %12 = vector.shape_cast %11 : vector<2x1xf32> to vector<2x1x1xf32>
    %13 = vector.broadcast %12 : vector<2x1x1xf32> to vector<2x8x1xf32>
    %14 = arith.subf %10, %13 : vector<2x8x1xf32>
    %15 = math.exp %14 : vector<2x8x1xf32>
    %cst_13 = arith.constant dense<0.000000e+00> : vector<2x1xf32>
    %16 = vector.multi_reduction <add>, %15, %cst_13 [1] : vector<2x8x1xf32> to vector<2x1xf32>
    %17 = vector.shape_cast %16 : vector<2x1xf32> to vector<2x1x1xf32>
    %18 = tpu.reciprocal %17 : vector<2x1x1xf32> -> vector<2x1x1xf32>
    %19 = vector.broadcast %18 : vector<2x1x1xf32> to vector<2x8x1xf32>
    %20 = arith.mulf %15, %19 : vector<2x8x1xf32>
    %21 = vector.broadcast %20 : vector<2x8x1xf32> to vector<2x8x32xf32>
    %22 = vector.broadcast %2 : vector<2x1x32xf32> to vector<2x8x32xf32>
    %23 = arith.mulf %21, %22 : vector<2x8x32xf32>
    %24 = vector.shape_cast %0 : vector<2x8x32xf32> to vector<16x32xf32>
    %c0_14 = arith.constant 0 : index
    %c0_15 = arith.constant 0 : index
    %25 = vector.load %arg5[%c0_14, %c0_15] : memref<32x32xf32, #tpu.memory_space<vmem>>, vector<32x32xf32>
    %cst_16 = arith.constant dense<0.000000e+00> : vector<16x32xf32>
    %26 = tpu.matmul %24, %25, %cst_16 {dimension_numbers = #tpu.dot_dimension_numbers<[1], [0], [0], [1], [0, 0, 1, 1], [], []>} : vector<16x32xf32>, vector<32x32xf32>, vector<16x32xf32> -> vector<16x32xf32>
    %27 = vector.shape_cast %26 : vector<16x32xf32> to vector<2x8x32xf32>
    %28 = arith.addf %27, %23 : vector<2x8x32xf32>
    %c0_17 = arith.constant 0 : index
    %c0_18 = arith.constant 0 : index
    %29 = vector.load %arg6[%c0_17, %c0_18] : memref<1x32xf32, #tpu.memory_space<vmem>>, vector<1x32xf32>
    %30 = vector.shape_cast %29 : vector<1x32xf32> to vector<1x1x32xf32>
    %31 = vector.broadcast %30 : vector<1x1x32xf32> to vector<2x8x32xf32>
    %32 = arith.addf %28, %31 : vector<2x8x32xf32>
    %cst_19 = arith.constant 0.000000e+00 : f32
    %33 = vector.broadcast %cst_19 : f32 to vector<2x8x32xf32>
    %34 = arith.maximumf %32, %33 : vector<2x8x32xf32>
    %c0_20 = arith.constant 0 : index
    %c0_21 = arith.constant 0 : index
    %c0_22 = arith.constant 0 : index
    %35 = vector.load %arg7[%c0_20, %c0_21, %c0_22] : memref<2x8x32xf32, #tpu.memory_space<vmem>>, vector<2x8x32xf32>
    tpu.vector_store %arg7[%c0_20, %c0_21, %c0_22], %34 {strides = array<i32>} : memref<2x8x32xf32, #tpu.memory_space<vmem>>, vector<2x8x32xf32>,
    return
  }
  func.func @transform_0(%arg0: i32) -> (i32, i32, i32) {
    %c0_i32 = arith.constant 0 : i32
    %c0_i32_0 = arith.constant 0 : i32
    %c0_i32_1 = arith.constant 0 : i32
    return %arg0, %c0_i32, %c0_i32_0 : i32, i32, i32
  }
  func.func @transform_1(%arg0: i32) -> (i32, i32, i32) {
    %c0_i32 = arith.constant 0 : i32
    %c0_i32_0 = arith.constant 0 : i32
    %c0_i32_1 = arith.constant 0 : i32
    return %arg0, %c0_i32, %c0_i32_0 : i32, i32, i32
  }
  func.func @transform_2(%arg0: i32) -> (i32, i32, i32) {
    %c0_i32 = arith.constant 0 : i32
    %c0_i32_0 = arith.constant 0 : i32
    %c0_i32_1 = arith.constant 0 : i32
    return %arg0, %c0_i32, %c0_i32_0 : i32, i32, i32
  }
  func.func @transform_3(%arg0: i32) -> (i32, i32, i32) {
    %c0_i32 = arith.constant 0 : i32
    %c0_i32_0 = arith.constant 0 : i32
    %c0_i32_1 = arith.constant 0 : i32
    return %arg0, %c0_i32, %c0_i32_0 : i32, i32, i32
  }
  func.func @transform_4(%arg0: i32) -> (i32, i32) {
    %c0_i32 = arith.constant 0 : i32
    %c0_i32_0 = arith.constant 0 : i32
    %c0_i32_1 = arith.constant 0 : i32
    return %c0_i32, %c0_i32_0 : i32, i32
  }
  func.func @transform_5(%arg0: i32) -> (i32, i32) {
    %c0_i32 = arith.constant 0 : i32
    %c0_i32_0 = arith.constant 0 : i32
    %c0_i32_1 = arith.constant 0 : i32
    return %c0_i32, %c0_i32_0 : i32, i32
  }
  func.func @transform_6(%arg0: i32) -> (i32, i32, i32) {
    %c0_i32 = arith.constant 0 : i32
    %c0_i32_0 = arith.constant 0 : i32
    %c0_i32_1 = arith.constant 0 : i32
    return %arg0, %c0_i32, %c0_i32_0 : i32, i32, i32
  }
}

</mosaic_0001>

<bundles_post_ra>
// kernel: tpu_custom_call.1
= control target key start
LH: loop header
LB: loop body
LE: loop exit
PB: predicated region body
PF: predicated region fallthrough
CT: control target
= control target key end

     0   :  { %11 = vsyncpa [#allocation3], 0  ;;  %s1087_s0 = inlined_call_operand.vmem [shape: f32[8,8,32], index: 0, kind: input, shape index: {}]   ;;  %s1088_s1 = inlined_call_operand.vmem [shape: f32[8,1,32], index: 1, kind: input, shape index: {}]   ;;  %s1089_s2 = inlined_call_operand.hbm [shape: f32[8,1,32], index: 2, kind: input, shape index: {}]   ;;  %s1090_s3 = inlined_call_operand.vmem [shape: f32[8,8,1], index: 3, kind: input, shape index: {}]   ;;  %s1091_s4 = inlined_call_operand.hbm [shape: f32[32,32], index: 4, kind: input, shape index: {}]   ;;  %s1092_s5 = inlined_call_operand.vmem [shape: f32[1,32], index: 5, kind: input, shape index: {}]   ;;  %s1093_s6 = inlined_call_operand.hbm [shape: f32[8,8,32], index: 6, kind: output, shape index: {}]  }
   0x1   :  { %13 = vsyncpa [#allocation3 + $0x1], 0 }
   0x2   :  { %14 = vsyncpa [#allocation6], 0 }
   0x3   :  { %15 = vsyncpa [#allocation4], 0 }
   0x4   :  { %17 = vsyncpa [#allocation4 + $0x1], 0  ;;  %s921_s21 = smov 0   ;;  %s923_s22 = smov 0  }
   0x5   :  { %s925_s23 = smov 0   ;;  %s927_s24 = smov 0  }
   0x6 LB: > { %s942_s25 = sadd.s32 4294967295, %s876_s24   ;;  %s640_s26 = sadd.s32 4294967294, %s876_s24   ;;  %s876_s24 = sphi %s927_s24, %s1102_s24   ;;  %s872_s23 = sphi %s925_s23, %s1101_s23   ;;  %s868_s22 = sphi %s923_s22, %s1100_s22   ;;  %s864_s21 = sphi %s921_s21, %s1099_s21  }
   0x7   : > { %p95_p0 = scmp.ne.s32.totalorder %s868_s22, %s864_s21  ;;  %p96_p1 = scmp.eq.s32.totalorder %s942_s25, 0 }
   0x8   : > { %p187_p2 = scmp.eq.s32.totalorder %s942_s25, 3  ;;  %p193_p3 = scmp.eq.s32.totalorder %s640_s26, 3 }
   0x9   : > { %p951_p4 = por %p96_p1, %p95_p0  ;;  %p641_p5 = scmp.ge.s32.totalorder %s876_s24, 1 }
   0xa   : > { %p956_p6 = por %p193_p3, %p95_p0  ;;  %p200_p7 = scmp.lt.s32.totalorder %s876_s24, 5 }
   0xb   : > { %s211_s7 = sshll.u32 %s1091_s4, 4  ;;  %s878_s9 = smov [#allocation5]   ;;  %s212_s7 = int_to_ptr.hbm [resolvable:$true] %s211_s7 }
   0xc   : > { %p964_p8 = pnand %p641_p5, %p200_p7  ;;  %s213_s10 = sshll.u32 %s878_s9, 4  ;;  %s214_s10 = int_to_ptr.vmem [resolvable:$true] %s213_s10 }
   0xd   : > { %s973_s11 = sadd.s32 1, %s876_s24   ;;  %s879_s12 = smov 128  }
   0xe   : > { %p675_p9 = pneg %p964_p8  ;;  %s880_s13 = smov 8  }
   0xf   : > { %s79_s14 = ssub.s32 %s876_s24, %s973_s11  ;;  %s82_s15 = sadd.s32 1, %s872_s23 }
  0x10   : > { %p676_p10 = pnand %p675_p9, %p96_p1  ;;  %p80_p11 = scmp.eq.s32.totalorder %s79_s14, 0 }
  0x11   : > { %p89_p12 = scmp.ne.s32.totalorder %s872_s23, %s868_s22  ;;  %p90_p13 = scmp.eq.s32.totalorder %s876_s24, 0 }
  0x12   : > { %678 = dma.hbm_to_vmem [thread:$0]  (!%p676_p10), %s212_s7, 512, %s214_s10, [#allocation6], %s879_s12, %s879_s12, %s880_s13  }
  0x13   : > { %p688_p0 = scmp.lt.s32.totalorder %s876_s24, 4  ;;  %p91_p3 = por %p90_p13, %p89_p12 }
  0x14   : > { %s983_s16 = scalar_select %p80_p11, %s872_s23, %s82_s15  }
  0x15   : > { %p987_p5 = por %p187_p2, %p89_p12  ;;  %s247_s18 = sand.u32 1, %s872_s23  }
  0x16   : > { %s645_s19 = sshll.u32 %s876_s24, 1  ;;  %s644_s20 = sshll.u32 %s247_s18, 1 }
  0x17   : > { %s255_s30 = scalar_lea.hbm %s1089_s2, %s645_s19  ;;  %s251_s9 = scalar_lea.vmem [#allocation2], %s644_s20 }
  0x18   : > { %s256_s7 = sshll.u32 %s255_s30, 4  ;;  %s258_s10 = sshll.u32 %s251_s9, 4  ;;  %s257_s7 = int_to_ptr.hbm [resolvable:$true] %s256_s7  ;;  %s259_s10 = int_to_ptr.vmem [resolvable:$true] %s258_s10 }
  0x19   : > { %p998_p7 = pnand %p688_p0, %p91_p3  ;;  %s248_s13 = scalar_lea.sflag [#allocation3], %s247_s18 }
  0x1a   : > { %s776_s14 = sshra.s32 %s257_s7, 4  ;;  %s783_s26 = scalar_lea.hbm %s1089_s2, 8  ;;  %s777_s14 = int_to_ptr.hbm [resolvable:$true] %s776_s14 }
  0x1b   : > { %s778_s15 = scalar_lea.hbm %s777_s14, 2  ;;  %p780_p9 = pneg %p998_p7 }
  0x1c   : > { %p779_p2 = scmp.ne.s32.totalorder %s777_s14, %s778_s15  ;;  %p784_p12 = scmp.lt.s32.totalorder %s777_s14, %s1089_s2 }
  0x1d   : > { %p785_p13 = scmp.lt.s32.totalorder %s783_s26, %s778_s15 }
  0x1e   : > { %p781_p10 = pnand %p780_p9, %p779_p2 }
  0x1f   : > { %p786_p0 = por %p785_p13, %p784_p12 }
  0x20   : > { %p782_p11 = pneg %p781_p10 }
  0x22   : > { %p787_p3 = pnand %p786_p0, %p782_p11 }
  0x24   : > { %790 = shalt.err (!%p787_p3)
}
  0x25   : > { %s881_s18 = smov 16   ;;  %s882_s9 = smov 1  }
  0x26   : > { %682 = dma.hbm_to_vmem [thread:$0]  (!%p998_p7), %s257_s7, 32, %s259_s10, %s248_s13, %s881_s18, %s881_s18, %s882_s9  }
  0x27   : > { %279 = sbr.rel (%p964_p8) target bundleno = 368 (0x170), region = 44  ;;  %s1015_s19 = sand.u32 (!%p964_p8), 1, %s868_s22  }
  0x28   : > { %s647_s20 = sshll.u32 (!%p964_p8), %s1015_s19, 1  ;;  %s282_s14 = scalar_lea.sflag (!%p964_p8), [#allocation3], %s1015_s19 }
  0x29   : > { %s1019_s15 = scalar_lea.vmem (!%p964_p8), [#allocation2], %s647_s20 }
  0x2c   : > { %851 = dma.done.wait (%p951_p4), %s282_s14, 32  }
  0x2d   : > { %853 = vsyncadd (%p951_p4), %s282_s14, 4294967264 }
  0x2e   : > { %855 = dma.done.wait (%p96_p1), [#allocation6], 512  }
  0x2f   : > { %857 = vsyncadd (%p96_p1), [#allocation6], 4294966784  ;;  %s650_s8 = sshll.u32 %s942_s25, 1  ;;  %vm369_vm0 = vcmask 261120   ;;  %vm380_vm1 = vcmask 7168   ;;  %v466_v21 = vld [vmem:[#allocation5 + $0x18] sm:$0xff] }
  0x30   : > { %p335_p8 = scmp.lt.s32.totalorder %s650_s8, 7  ;;  %485 = vmatpush.msra.mxu0 %v466_v21  ;;  %663 = vmatpush.msra.mxu1 %v466_v21  ;;  %v465_v25 = vld [vmem:[#allocation5 + $0x10] sm:$0xff]  ;;  %v464_v28 = vld [vmem:[#allocation5 + $0x8] sm:$0xff]  ;;  %v463_v31 = vld [vmem:[#allocation5] sm:$0xff]  ;;  %v883_v34 = vmov 0   ;;  %s826_s20 = scalar_lea.hbm %s1093_s6, 64 }
  0x31   : > { %731 = vset.pattern.permute.xlu1 %v883_v34  ;;  %732 = vset.pattern.permute.xlu0 %v883_v34 }
  0x32   : > { %s1104_s8 = smov (!%p335_p8, %s650_s8), 7  ;;  %486 = vmatpush.msra.mxu0 %v465_v25  ;;  %664 = vmatpush.msra.mxu1 %v465_v25 }
  0x33   : > { %s651_s7 = sshll.u32 %s1104_s8, 3  ;;  %s343_s13 = scalar_lea.vmem %s1088_s1, %s1104_s8 }
  0x34   : > { %s338_s27 = scalar_lea.vmem %s1087_s0, %s651_s7  ;;  %v733_v1 = vld [vmem:[%s343_s13] ss:$0 sm:$0xff]  ;;  %v734_v3 = vld [vmem:[%s343_s13 + $0x1] ss:$0 sm:$0xff]  ;;  %s350_s9 = scalar_lea.vmem %s1090_s3, %s651_s7  ;;  %487 = vmatpush.msra.mxu0 %v464_v28  ;;  %665 = vmatpush.msra.mxu1 %v464_v28 }
  0x35   : > { %v353_v0 = vld [vmem:[%s338_s27] sm:$0xff]  ;;  %v354_v4 = vld [vmem:[%s338_s27 + $0x8] sm:$0xff]  ;;  %s649_s8 = sshll.u32 %s1015_s19, 4  ;;  %s662_s7 = sshll.u32 %s942_s25, 4 }
  0x36   : > { %v367_v2 = vmul.f32 %v733_v1, %v353_v0  ;;  %v368_v6 = vmul.f32 %v734_v3, %v354_v4  ;;  %v359_v8 = vld [vmem:[%s350_s9] sm:$0xff]  ;;  %v360_v15 = vld [vmem:[%s350_s9 + $0x8] sm:$0xff]  ;;  %488 = vmatpush.msra.mxu0 %v463_v31  ;;  %666 = vmatpush.msra.mxu1 %v463_v31  ;;  %s520_s13 = scalar_lea.hbm %s1093_s6, %s662_s7  ;;  %s333_s26 = scalar_lea.vmem [#allocation7], %s649_s8 }
  0x37   : > { %655 = vmatmul.msk.f32.vlgmr.msra.gmra.mxu0 %vm369_vm0, %v353_v0  ;;  %656 = vmatmul.msk.f32.vlgmr.msra.gmra.mxu1 %vm369_vm0, %v354_v4  ;;  %s521_s29 = sshll.u32 %s333_s26, 4  ;;  %s523_s27 = sshll.u32 %s520_s13, 4  ;;  %s522_s29 = int_to_ptr.vmem [resolvable:$true] %s521_s29  ;;  %s524_s27 = int_to_ptr.hbm [resolvable:$true] %s523_s27 }
  0x38   : > { %v370_v5 = vsel %vm369_vm0, %v367_v2, 0.0  ;;  %v373_v7 = vsel %vm369_vm0, %v368_v6, 0.0  ;;  %s509_s25 = scalar_lea.sflag [#allocation4], %s1015_s19 }
  0x39   : > { %371 = vadd.xlane.f32.xlu0 %v370_v5 }
  0x41   : > { %374 = vadd.xlane.f32.xlu0 %v373_v7 }
  0xac   : > { %v372_v9 = vpop.xlane.xlu0 %371 }
  0xad   : > { %v376_v10 = vmul.f32 0.17677669, %v372_v9 }
  0xaf   : > { %v378_v11 = vadd.f32 %v376_v10, %v359_v8 }
  0xb1   : > { %v381_v12 = vsel %vm380_vm1, %v378_v11, -inf }
  0xb2   : > { %v382_v13 = vrot.slane %v381_v12, 4 }
  0xb4   : > { %v383_v14 = vmax.f32 %v381_v12, %v382_v13  ;;  %v375_v16 = vpop.xlane.xlu0 %374  ;;  %v735_v13 = vld [vmem:[%s1019_s15] ss:$0 sm:$0xff] }
  0xb5   : > { %v377_v17 = vmul.f32 0.17677669, %v375_v16 }
  0xb6   : > { %v384_v18 = vrot.slane %v383_v14, 2 }
  0xb7   : > { %v379_v19 = vadd.f32 %v377_v17, %v360_v15  ;;  %v490_v15 = vpop.f32.mrf.mxu0  ;;  %v736_v17 = vld [vmem:[%s1092_s5] ss:$0 sm:$0xff] }
  0xb8   : > { %v385_v20 = vmax.f32 %v383_v14, %v384_v18 }
  0xb9   : > { %v388_v22 = vsel %vm380_vm1, %v379_v19, -inf }
  0xba   : > { %v386_v23 = vrot.slane %v385_v20, 1  ;;  %v389_v24 = vrot.slane %v388_v22, 4 }
  0xbc   : > { %v387_v26 = vmax.f32 %v385_v20, %v386_v23  ;;  %v390_v27 = vmax.f32 %v388_v22, %v389_v24  ;;  %v737_v20 = vld [vmem:[%s1019_s15 + $0x1] ss:$0 sm:$0xff]  ;;  %v493_v23 = vpop.f32.mrf.mxu1  ;;  %s820_s15 = sshra.s32 %s524_s27, 4  ;;  %s821_s15 = int_to_ptr.hbm [resolvable:$true] %s820_s15 }
  0xbd   : > { %s822_s30 = scalar_lea.hbm %s821_s15, 16  ;;  %p827_p2 = scmp.lt.s32.totalorder %s821_s15, %s1093_s6 }
  0xbe   : > { %v395_v29 = vsub.f32 %v378_v11, %v387_v26  ;;  %v391_v30 = vrot.slane %v390_v27, 2  ;;  %p823_p1 = scmp.ne.s32.totalorder %s821_s15, %s822_s30  ;;  %p828_p9 = scmp.lt.s32.totalorder %s826_s20, %s822_s30 }
  0xc0   : > { %v397_v32 = vmul.f32 1.442695, %v395_v29  ;;  %v392_v33 = vmax.f32 %v390_v27, %v391_v30  ;;  %p824_p4 = pnand %p823_p1, %p987_p5  ;;  %p829_p10 = por %p828_p9, %p827_p2 }
  0xc2   : > { %738 = vpow2.f32 %v397_v32  ;;  %v393_v35 = vrot.slane %v392_v33, 1  ;;  %p825_p7 = pneg %p824_p4 }
  0xc4   : > { %v394_v36 = vmax.f32 %v392_v33, %v393_v35  ;;  %p830_p11 = pnand %p829_p10, %p825_p7 }
  0xc6   : > { %v396_v37 = vsub.f32 %v379_v19, %v394_v36 }
  0xc8   : > { %v739_v38 = vpop.eup %738  ;;  %v399_v39 = vmul.f32 1.442695, %v396_v37 }
  0xc9   : > { %v401_v40 = vsel %vm380_vm1, %v739_v38, 0.0 }
  0xca   : > { %v402_v41 = vrot.slane %v401_v40, 4  ;;  %740 = vpow2.f32 %v399_v39 }
  0xcc   : > { %v403_v42 = vadd.f32 %v402_v41, %v401_v40 }
  0xce   : > { %v404_v43 = vrot.slane %v403_v42, 2 }
  0xd0   : > { %v741_v44 = vpop.eup %740  ;;  %v405_v45 = vadd.f32 %v404_v43, %v403_v42 }
  0xd1   : > { %v408_v46 = vsel %vm380_vm1, %v741_v44, 0.0 }
  0xd2   : > { %v406_v47 = vrot.slane %v405_v45, 1  ;;  %v409_v48 = vrot.slane %v408_v46, 4 }
  0xd4   : > { %v407_v49 = vadd.f32 %v406_v47, %v405_v45  ;;  %v410_v50 = vadd.f32 %v409_v48, %v408_v46 }
  0xd6   : > { %742 = vrcp.f32 %v407_v49  ;;  %v411_v51 = vrot.slane %v410_v50, 2  ;;  %v426_v58 = vand.u32 2147483648, %v407_v49  ;;  %v424_v60 = vand.u32 2147483647, %v407_v49 }
  0xd7   : > { %vm420_vm3 = vweird.f32 %v407_v49 }
  0xd8   : > { %v412_v52 = vadd.f32 %v411_v51, %v410_v50  ;;  %v427_v63 = vor.u32 1.1754944e-38, %v426_v58  ;;  %vm425_vm5 = vcmp.eq.f32.partialorder %v424_v60, 8.507059e+37 }
  0xda   : > { %v413_v53 = vrot.slane %v412_v52, 1 }
  0xdc   : > { %v743_v54 = vpop.eup %742  ;;  %v414_v55 = vadd.f32 %v413_v53, %v412_v52 }
  0xdd   : > { %v416_v56 = vmul.f32 %v743_v54, %v407_v49  ;;  %vm421_vm2 = vweird.f32 %v743_v54 }
  0xde   : > { %744 = vrcp.f32 %v414_v55  ;;  %vm422_vm4 = vmor %vm420_vm3, %vm421_vm2  ;;  %v440_v5 = vand.u32 2147483648, %v414_v55  ;;  %v438_v7 = vand.u32 2147483647, %v414_v55  ;;  %vm434_vm7 = vweird.f32 %v414_v55 }
  0xdf   : > { %v417_v57 = vsub.f32 1.0, %v416_v56 }
  0xe0   : > { %v441_v9 = vor.u32 1.1754944e-38, %v440_v5  ;;  %vm439_vm9 = vcmp.eq.f32.partialorder %v438_v7, 8.507059e+37 }
  0xe1   : > { %v418_v59 = vmul.f32 %v743_v54, %v417_v57 }
  0xe3   : > { %v419_v61 = vadd.f32 %v743_v54, %v418_v59 }
  0xe4   : > { %v745_v62 = vpop.eup %744 }
  0xe5   : > { %v423_v0 = vsel %vm422_vm4, %v743_v54, %v419_v61  ;;  %v430_v1 = vmul.f32 %v745_v62, %v414_v55  ;;  %vm435_vm6 = vweird.f32 %v745_v62 }
  0xe6   : > { %v428_v2 = vsel %vm425_vm5, %v427_v63, %v423_v0  ;;  %vm436_vm8 = vmor %vm434_vm7, %vm435_vm6 }
  0xe7   : > { %v443_v3 = vmul.f32 %v739_v38, %v428_v2  ;;  %v431_v4 = vsub.f32 1.0, %v430_v1 }
  0xe9   : > { %447 = vperm.xlu1 %731, %v443_v3   ;;  %v432_v6 = vmul.f32 %v745_v62, %v431_v4 }
  0xeb   : > { %v433_v8 = vadd.f32 %v745_v62, %v432_v6 }
  0xed   : > { %v437_v10 = vsel %vm436_vm8, %v745_v62, %v433_v8 }
  0xee   : > { %v442_v11 = vsel %vm439_vm9, %v441_v9, %v437_v10 }
  0xef   : > { %v444_v12 = vmul.f32 %v741_v44, %v442_v11 }
  0xf1   : > { %452 = vperm.xlu1 %731, %v444_v12  }
 0x15b   : > { %v448_v14 = vpop.permute.xlu1 %447 }
 0x15c   : > { %v461_v16 = vmul.f32 %v735_v13, %v448_v14 }
 0x15e   : > { %v496_v18 = vadd.f32 %v490_v15, %v461_v16 }
 0x160   : > { %v502_v19 = vadd.f32 %v736_v17, %v496_v18 }
 0x162   : > { %v504_v21 = vmax.f32 %v502_v19, 0.0 }
 0x163   : > { %v453_v22 = vpop.permute.xlu1 %452 }
 0x164   : > { %506 = vst.msk [vmem:[%s333_s26] sm:$0xff] %vm369_vm0, %v504_v21  ;;  %v462_v24 = vmul.f32 %v737_v20, %v453_v22 }
 0x166   : > { %v497_v25 = vadd.f32 %v493_v23, %v462_v24 }
 0x168   : > { %v503_v26 = vadd.f32 %v736_v17, %v497_v25 }
 0x16a   : > { %v505_v27 = vmax.f32 %v503_v26, 0.0 }
 0x16c   : > { %507 = vst.msk [vmem:[%s333_s26 + $0x8] sm:$0xff] %vm369_vm0, %v505_v27 }
 0x16d   : > { %833 = shalt.err (!%p830_p11)
}
 0x16e   : > { %s884_s19 = smov 128   ;;  %s885_s7 = smov 8  }
 0x16f   : > { %673 = dma.vmem_to_hbm [thread:$0]  (%p987_p5), %s522_s29, 256, %s524_s27, %s509_s25, %s884_s19, %s884_s19, %s885_s7  }
 0x170 PF: > { %p690_p12 = scmp.ge.s32.totalorder %s876_s24, 2  ;;  %s538_s10 = sand.u32 1, %s864_s21  }
 0x171   : > { %s539_s12 = scalar_lea.sflag [#allocation4], %s538_s10 }
 0x172   : > { %p684_p13 = pnand %p690_p12, %p956_p6 }
 0x174   : > { %p685_p0 = pneg %p684_p13 }
 0x176   : > { %859 = dma.done.wait (%p685_p0), %s539_s12, 256  }
 0x177   : > { %861 = vsyncadd (%p685_p0), %s539_s12, 4294967040  ;;  %p20_p3 = scmp.ge.s32.totalorder %s973_s11, 6   ;;  %s1099_s21 = smov %s868_s22 }
 0x178   : > { %s1100_s22 = smov %s872_s23  ;;  %s1101_s23 = smov %s983_s16 }
 0x179   : > { %s1102_s24 = smov %s973_s11  ;;  %22 = sbr.rel (!%p20_p3) target bundleno = 6 (0x6), region = 102 }
 0x17e   :  { %545 = vsyncpa [#allocation3], 1 }
 0x17f   :  { %547 = vsyncpa [#allocation3 + $0x1], 1 }
 0x180   :  { %548 = vsyncpa [#allocation6], 1 }
 0x181   :  { %549 = vsyncpa [#allocation4], 1 }
 0x182   :  { %551 = vsyncpa [#allocation4 + $0x1], 1 }

</bundles_post_ra>
